<compile_context>
chip_gen: v7x
topology: tpu7x:2x2x1
jax: 0.10.0
libtpu: 0.0.40
codegen_flags: <defaults>
</compile_context>

<pallas_src>
import functools

import jax
import jax.numpy as jnp
import numpy as np
from jax import lax
from jax.experimental import pallas as pl
from jax.experimental.pallas import tpu as pltpu

# ------------------------- model configuration ------------------------------
ETYPES = ("sim", "cor")
NODE_NUMS = 64
NODEID_EMB_DIM = 8
SPARSE_MAXS = [11, 7, 5, NODE_NUMS]          # use_nodeid_emb=True -> node_nums appended
SPARSE_EMB_DIM = [8, 8, 8, NODEID_EMB_DIM]   # sum == 32
HIDDEN_DIM = 32
OUTPUT_DIM = 32
N_LAYERS = 2
NUM_SRC0 = NODE_NUMS                          # src nodes of block 0
BLOCK_SIZES = [(32, 64), (16, 32)]            # (num_dst, num_src) per block

NUM_FIELDS = len(SPARSE_MAXS)
ROW_OFFSETS = np.concatenate([[0], np.cumsum(SPARSE_MAXS)[:-1]]).astype(np.int32)
COL_OFFSETS = np.concatenate([[0], np.cumsum(SPARSE_EMB_DIM)[:-1]]).astype(np.int32)
TOTAL_ROWS = int(np.sum(SPARSE_MAXS))         # 87
BIAS_ROW = TOTAL_ROWS                         # always-hot row carrying fc_input bias
PADDED_ROWS = 128                             # lane-friendly contraction dim
EMB_TOTAL = int(np.sum(SPARSE_EMB_DIM))       # 32


# ------------------------------ Pallas kernel --------------------------------
def _full_spec(shape):
    """Whole-array block (single grid step)."""
    nd = len(shape)
    return pl.BlockSpec(shape, lambda i, _nd=nd: (0,) * _nd)


def _fused_forward_kernel(abc_ref, xs_ref, min_ref, *rest,
                          num_blocks, num_fields, bias_row):
    adj_refs = rest[:num_blocks]
    wout_ref, bout_ref, wcross_ref, z_ref = rest[num_blocks:]

    n0 = xs_ref.shape[0]               # 64 src nodes of block 0
    r = min_ref.shape[0]               # 128 (padded embedding rows + bias row)

    # --- one-hot of shifted sparse indices (+ always-hot bias row) ---------
    xs = xs_ref[...]                   # [n0, num_fields] int32 (pre-shifted)
    col = lax.broadcasted_iota(jnp.int32, (n0, r), 1)
    oh = (col == bias_row).astype(jnp.float32)
    for i in range(num_fields):
        oh = oh + (col == xs[:, i:i + 1]).astype(jnp.float32)

    # --- embedding lookup + fc_input (+bias), both etypes, one MXU matmul ---
    # min_ref = stacked_tables @ blockdiag(W_in_sim, W_in_cor); bias row appended.
    h = jnp.dot(oh, min_ref[...], preferred_element_type=jnp.float32)   # [n0, 64]

    # --- GraphSAGE mean-aggregation layers (SAGESimCorConv) -----------------
    for l in range(num_blocks):
        adj = adj_refs[l][...]                          # [nd, ns] row-normalized
        nd = adj.shape[0]
        h = h[:nd, :] + jnp.dot(adj, h, preferred_element_type=jnp.float32)
        if l != num_blocks - 1:
            h = jnp.maximum(h, 0.0)                     # ReLU on all but last

    # --- fc_output (block-diag over etypes) + pre-broadcast bias ------------
    out = jnp.dot(h, wout_ref[...], preferred_element_type=jnp.float32) \
        + bout_ref[...]                                  # [nd_last, 64]

    # --- SemanticIntegration with cross matrix [[0, ws2c],[wc2s, 0]] --------
    a1 = abc_ref[0]
    a2 = abc_ref[1]
    b2 = abc_ref[2]
    wc = wcross_ref[...]
    cross1 = jnp.dot(out, wc, preferred_element_type=jnp.float32)
    z1 = (1.0 - a1) * out + a1 * cross1
    z_ref[...] = (1.0 - a2 - b2) * out + jnp.dot(
        a2 * out + b2 * z1, wc, preferred_element_type=jnp.float32)


def graphsage_simcor_forward(packed, blocks, x):
    """Fused forward: one pallas_call for embeddings, both etypes, SI."""
    n0, nf = x.shape
    xs = (x + packed["row_off"][None, :]).astype(jnp.int32)
    nd_last = blocks[-1].shape[0]
    d2 = packed["w_out"].shape[1]                       # 2 * OUTPUT_DIM

    kern = functools.partial(_fused_forward_kernel,
                             num_blocks=len(blocks),
                             num_fields=nf,
                             bias_row=BIAS_ROW)
    operands = [packed["abc"], xs, packed["m_in"], *blocks,
                packed["w_out"], packed["b_out"], packed["w_cross"]]
    in_specs = [pl.BlockSpec(memory_space=pltpu.MemorySpace.SMEM)] + \
               [_full_spec(op.shape) for op in operands[1:]]

    z = pl.pallas_call(
        kern,
        grid=(1,),
        in_specs=in_specs,
        out_specs=_full_spec((nd_last, d2)),
        out_shape=jax.ShapeDtypeStruct((nd_last, d2), jnp.float32),
        compiler_params=pltpu.CompilerParams(dimension_semantics=("arbitrary",)),
    )(*operands)

    d = d2 // 2
    return {"sim": z[:, :d], "cor": z[:, d:]}


# ------------------------------- parameters ----------------------------------
def _dense_init(key, shape, scale=0.1):
    return scale * jax.random.normal(key, shape, dtype=jnp.float32)


def init_params(key):
    params = {"emb": {}, "fc_in": {}, "fc_out": {}, "si": {}}
    for mode in ETYPES:
        tables = []
        for m, d in zip(SPARSE_MAXS, SPARSE_EMB_DIM):
            key, sub = jax.random.split(key)
            tables.append(_dense_init(sub, (m, d)))
        params["emb"][mode] = tables

        key, kw, kb = jax.random.split(key, 3)
        params["fc_in"][mode] = {
            "w": _dense_init(kw, (EMB_TOTAL, HIDDEN_DIM)),   # [in, out]
            "b": _dense_init(kb, (HIDDEN_DIM,)),
        }
        key, kw, kb = jax.random.split(key, 3)
        params["fc_out"][mode] = {
            "w": _dense_init(kw, (HIDDEN_DIM, OUTPUT_DIM)),
            "b": _dense_init(kb, (OUTPUT_DIM,)),
        }

    key, k1, k2 = jax.random.split(key, 3)
    params["si"] = {
        "ws2c": _dense_init(k1, (OUTPUT_DIM, OUTPUT_DIM)),  # sim2cor weight^T
        "wc2s": _dense_init(k2, (OUTPUT_DIM, OUTPUT_DIM)),  # cor2sim weight^T
        # PyTorch inits a1/a2/b2 to zeros; nonzero here so the fused
        # semantic-integration path is actually exercised.
        "abc": jnp.array([0.25, 0.3, 0.2], dtype=jnp.float32),
    }
    return params


def pack_params(params):
    """Host-side packing: block-diag weights, folded embedding+fc_in matrix."""
    d_in, d_h, d_o = EMB_TOTAL, HIDDEN_DIM, OUTPUT_DIM

    # stacked embedding tables: rows = fields/ids, cols = [sim feats | cor feats]
    t = np.zeros((PADDED_ROWS, 2 * d_in), np.float32)
    for m_i, mode in enumerate(ETYPES):
        for f, tab in enumerate(params["emb"][mode]):
            r0 = int(ROW_OFFSETS[f])
            c0 = m_i * d_in + int(COL_OFFSETS[f])
            tab_np = np.asarray(tab)
            t[r0:r0 + tab_np.shape[0], c0:c0 + tab_np.shape[1]] = tab_np

    # block-diag fc_input, folded through the tables; bias lives in BIAS_ROW
    w_in = np.zeros((2 * d_in, 2 * d_h), np.float32)
    b_in = np.zeros((2 * d_h,), np.float32)
    for m_i, mode in enumerate(ETYPES):
        w_in[m_i * d_in:(m_i + 1) * d_in, m_i * d_h:(m_i + 1) * d_h] = \
            np.asarray(params["fc_in"][mode]["w"])
        b_in[m_i * d_h:(m_i + 1) * d_h] = np.asarray(params["fc_in"][mode]["b"])
    m_in = t @ w_in
    m_in[BIAS_ROW, :] = b_in

    # block-diag fc_output + lane-concatenated bias (pre-broadcast to full tile)
    w_out = np.zeros((2 * d_h, 2 * d_o), np.float32)
    b_out = np.zeros((2 * d_o,), np.float32)
    for m_i, mode in enumerate(ETYPES):
        w_out[m_i * d_h:(m_i + 1) * d_h, m_i * d_o:(m_i + 1) * d_o] = \
            np.asarray(params["fc_out"][mode]["w"])
        b_out[m_i * d_o:(m_i + 1) * d_o] = np.asarray(params["fc_out"][mode]["b"])

    # semantic-integration cross matrix [[0, ws2c], [wc2s, 0]]
    w_cross = np.zeros((2 * d_o, 2 * d_o), np.float32)
    w_cross[0:d_o, d_o:2 * d_o] = np.asarray(params["si"]["ws2c"])
    w_cross[d_o:2 * d_o, 0:d_o] = np.asarray(params["si"]["wc2s"])

    nd_last = BLOCK_SIZES[-1][0]
    return {
        "row_off": jnp.asarray(ROW_OFFSETS, jnp.int32),
        "m_in": jnp.asarray(m_in),
        "w_out": jnp.asarray(w_out),
        "b_out": jnp.tile(jnp.asarray(b_out)[None, :], (nd_last, 1)),
        "w_cross": jnp.asarray(w_cross),
        "abc": params["si"]["abc"],
    }


# ------------------------------- reference -----------------------------------
def reference_forward(params, blocks, x):
    """Pure-JAX reference of the same math (for validation)."""
    hp = jax.lax.Precision.HIGHEST
    out = {}
    for mode in ETYPES:
        feats = [tab[x[:, i]] for i, tab in enumerate(params["emb"][mode])]
        h = jnp.concatenate(feats, axis=1)
        h = jnp.dot(h, params["fc_in"][mode]["w"], precision=hp) + params["fc_in"][mode]["b"]
        for l, adj in enumerate(blocks):
            nd = adj.shape[0]
            h = h[:nd] + jnp.dot(adj, h, precision=hp)
            if l != len(blocks) - 1:
                h = jnp.maximum(h, 0.0)
            else:
                h = jnp.dot(h, params["fc_out"][mode]["w"], precision=hp) + params["fc_out"][mode]["b"]
        out[mode] = h
    a1, a2, b2 = params["si"]["abc"]
    ws2c, wc2s = params["si"]["ws2c"], params["si"]["wc2s"]
    sim, cor = out["sim"], out["cor"]
    z1sim = (1 - a1) * sim + a1 * jnp.dot(cor, wc2s, precision=hp)
    z1cor = (1 - a1) * cor + a1 * jnp.dot(sim, ws2c, precision=hp)
    z2sim = (1 - a2 - b2) * sim + a2 * jnp.dot(cor, wc2s, precision=hp) + b2 * jnp.dot(z1cor, wc2s, precision=hp)
    z2cor = (1 - a2 - b2) * cor + a2 * jnp.dot(sim, ws2c, precision=hp) + b2 * jnp.dot(z1sim, ws2c, precision=hp)
    return {"sim": z2sim, "cor": z2cor}


# --------------------------------- data --------------------------------------
def make_block(key, num_dst, num_src):
    adj = (jax.random.uniform(key, (num_dst, num_src)) < 0.3).astype(jnp.float32)
    # guarantee nonzero in-degree; dst nodes are the first num_dst src nodes
    idx = jnp.arange(num_dst)
    adj = adj.at[idx, idx].set(1.0)
    deg = adj.sum(axis=1, keepdims=True)
    return adj / deg                        # row-normalized -> mean aggregation


if __name__ == "__main__":
    key = jax.random.PRNGKey(0)
    key, kp = jax.random.split(key)
    params = init_params(kp)
    packed = pack_params(params)

    # integer sparse-feature matrix x: [NUM_SRC0, num_fields]
    cols = []
    for i in range(NUM_FIELDS - 1):
        key, sub = jax.random.split(key)
        cols.append(jax.random.randint(sub, (NUM_SRC0,), 0, SPARSE_MAXS[i]))
    cols.append(jnp.arange(NUM_SRC0))       # node-id feature (use_nodeid_emb)
    x = jnp.stack(cols, axis=1).astype(jnp.int32)

    blocks = []
    for (nd, ns) in BLOCK_SIZES:
        key, sub = jax.random.split(key)
        blocks.append(make_block(sub, nd, ns))

    out = graphsage_simcor_forward(packed, blocks, x)
    jax.block_until_ready(out)

    ref = reference_forward(params, blocks, x)
    for mode in ETYPES:
        np.testing.assert_allclose(
            np.asarray(out[mode]), np.asarray(ref[mode]), atol=1e-2, rtol=1e-2)

    print("KERNEL_OK")
</pallas_src>

<mosaic_0001>
module attributes {stable_mosaic.version = 11 : i64} {
  func.func @_fused_forward_kernel(%arg0: i32, %arg1: memref<3xf32, #tpu.memory_space<smem>>, %arg2: memref<64x4xi32, #tpu.memory_space<vmem>>, %arg3: memref<128x64xf32, #tpu.memory_space<vmem>>, %arg4: memref<32x64xf32, #tpu.memory_space<vmem>>, %arg5: memref<16x32xf32, #tpu.memory_space<vmem>>, %arg6: memref<64x64xf32, #tpu.memory_space<vmem>>, %arg7: memref<16x64xf32, #tpu.memory_space<vmem>>, %arg8: memref<64x64xf32, #tpu.memory_space<vmem>>, %arg9: memref<16x64xf32, #tpu.memory_space<vmem>>) attributes {dimension_semantics = [#tpu.dimension_semantics<arbitrary>], iteration_bounds = array<i64: 1>, scalar_prefetch = 0 : i64, scratch_operands = 0 : i64, tpu.core_type = #tpu.core_type<tc>, window_params = [{transform_indices = @transform_0, window_bounds = array<i64: 3>}, {pipeline_mode = #tpu.pipeline_mode<synchronous>, transform_indices = @transform_1, window_bounds = array<i64: 64, 4>}, {pipeline_mode = #tpu.pipeline_mode<synchronous>, transform_indices = @transform_2, window_bounds = array<i64: 128, 64>}, {pipeline_mode = #tpu.pipeline_mode<synchronous>, transform_indices = @transform_3, window_bounds = array<i64: 32, 64>}, {pipeline_mode = #tpu.pipeline_mode<synchronous>, transform_indices = @transform_4, window_bounds = array<i64: 16, 32>}, {pipeline_mode = #tpu.pipeline_mode<synchronous>, transform_indices = @transform_5, window_bounds = array<i64: 64, 64>}, {pipeline_mode = #tpu.pipeline_mode<synchronous>, transform_indices = @transform_6, window_bounds = array<i64: 16, 64>}, {pipeline_mode = #tpu.pipeline_mode<synchronous>, transform_indices = @transform_7, window_bounds = array<i64: 64, 64>}, {pipeline_mode = #tpu.pipeline_mode<synchronous>, transform_indices = @transform_8, window_bounds = array<i64: 16, 64>}]} {
    %c0 = arith.constant 0 : index
    %c0_0 = arith.constant 0 : index
    %0 = vector.load %arg2[%c0, %c0_0] : memref<64x4xi32, #tpu.memory_space<vmem>>, vector<64x4xi32>
    %1 = tpu.iota {dimensions = array<i32: 1>} : vector<64x128xi32>
    %c87_i32 = arith.constant 87 : i32
    %2 = vector.broadcast %c87_i32 : i32 to vector<64x128xi32>
    %3 = arith.cmpi eq, %1, %2 : vector<64x128xi32>
    %4 = arith.extui %3 : vector<64x128xi1> to vector<64x128xi32>
    %5 = arith.sitofp %4 : vector<64x128xi32> to vector<64x128xf32>
    %6 = vector.extract_strided_slice %0 {offsets = [0, 0], sizes = [64, 1], strides = [1, 1]} : vector<64x4xi32> to vector<64x1xi32>
    %7 = vector.broadcast %6 : vector<64x1xi32> to vector<64x128xi32>
    %8 = arith.cmpi eq, %1, %7 : vector<64x128xi32>
    %9 = arith.extui %8 : vector<64x128xi1> to vector<64x128xi32>
    %10 = arith.sitofp %9 : vector<64x128xi32> to vector<64x128xf32>
    %11 = arith.addf %5, %10 : vector<64x128xf32>
    %12 = vector.extract_strided_slice %0 {offsets = [0, 1], sizes = [64, 1], strides = [1, 1]} : vector<64x4xi32> to vector<64x1xi32>
    %13 = vector.broadcast %12 : vector<64x1xi32> to vector<64x128xi32>
    %14 = arith.cmpi eq, %1, %13 : vector<64x128xi32>
    %15 = arith.extui %14 : vector<64x128xi1> to vector<64x128xi32>
    %16 = arith.sitofp %15 : vector<64x128xi32> to vector<64x128xf32>
    %17 = arith.addf %11, %16 : vector<64x128xf32>
    %18 = vector.extract_strided_slice %0 {offsets = [0, 2], sizes = [64, 1], strides = [1, 1]} : vector<64x4xi32> to vector<64x1xi32>
    %19 = vector.broadcast %18 : vector<64x1xi32> to vector<64x128xi32>
    %20 = arith.cmpi eq, %1, %19 : vector<64x128xi32>
    %21 = arith.extui %20 : vector<64x128xi1> to vector<64x128xi32>
    %22 = arith.sitofp %21 : vector<64x128xi32> to vector<64x128xf32>
    %23 = arith.addf %17, %22 : vector<64x128xf32>
    %24 = vector.extract_strided_slice %0 {offsets = [0, 3], sizes = [64, 1], strides = [1, 1]} : vector<64x4xi32> to vector<64x1xi32>
    %25 = vector.broadcast %24 : vector<64x1xi32> to vector<64x128xi32>
    %26 = arith.cmpi eq, %1, %25 : vector<64x128xi32>
    %27 = arith.extui %26 : vector<64x128xi1> to vector<64x128xi32>
    %28 = arith.sitofp %27 : vector<64x128xi32> to vector<64x128xf32>
    %29 = arith.addf %23, %28 : vector<64x128xf32>
    %c0_1 = arith.constant 0 : index
    %c0_2 = arith.constant 0 : index
    %30 = vector.load %arg3[%c0_1, %c0_2] : memref<128x64xf32, #tpu.memory_space<vmem>>, vector<128x64xf32>
    %cst = arith.constant dense<0.000000e+00> : vector<64x64xf32>
    %31 = tpu.matmul %29, %30, %cst {dimension_numbers = #tpu.dot_dimension_numbers<[1], [0], [0], [1], [0, 0, 1, 1], [], []>} : vector<64x128xf32>, vector<128x64xf32>, vector<64x64xf32> -> vector<64x64xf32>
    %c0_3 = arith.constant 0 : index
    %c0_4 = arith.constant 0 : index
    %32 = vector.load %arg4[%c0_3, %c0_4] : memref<32x64xf32, #tpu.memory_space<vmem>>, vector<32x64xf32>
    %33 = vector.extract_strided_slice %31 {offsets = [0, 0], sizes = [32, 64], strides = [1, 1]} : vector<64x64xf32> to vector<32x64xf32>
    %cst_5 = arith.constant dense<0.000000e+00> : vector<32x64xf32>
    %34 = tpu.matmul %32, %31, %cst_5 {dimension_numbers = #tpu.dot_dimension_numbers<[1], [0], [0], [1], [0, 0, 1, 1], [], []>} : vector<32x64xf32>, vector<64x64xf32>, vector<32x64xf32> -> vector<32x64xf32>
    %35 = arith.addf %33, %34 : vector<32x64xf32>
    %cst_6 = arith.constant 0.000000e+00 : f32
    %36 = vector.broadcast %cst_6 : f32 to vector<32x64xf32>
    %37 = arith.maximumf %35, %36 : vector<32x64xf32>
    %c0_7 = arith.constant 0 : index
    %c0_8 = arith.constant 0 : index
    %38 = vector.load %arg5[%c0_7, %c0_8] : memref<16x32xf32, #tpu.memory_space<vmem>>, vector<16x32xf32>
    %39 = vector.extract_strided_slice %37 {offsets = [0, 0], sizes = [16, 64], strides = [1, 1]} : vector<32x64xf32> to vector<16x64xf32>
    %cst_9 = arith.constant dense<0.000000e+00> : vector<16x64xf32>
    %40 = tpu.matmul %38, %37, %cst_9 {dimension_numbers = #tpu.dot_dimension_numbers<[1], [0], [0], [1], [0, 0, 1, 1], [], []>} : vector<16x32xf32>, vector<32x64xf32>, vector<16x64xf32> -> vector<16x64xf32>
    %41 = arith.addf %39, %40 : vector<16x64xf32>
    %c0_10 = arith.constant 0 : index
    %c0_11 = arith.constant 0 : index
    %42 = vector.load %arg6[%c0_10, %c0_11] : memref<64x64xf32, #tpu.memory_space<vmem>>, vector<64x64xf32>
    %cst_12 = arith.constant dense<0.000000e+00> : vector<16x64xf32>
    %43 = tpu.matmul %41, %42, %cst_12 {dimension_numbers = #tpu.dot_dimension_numbers<[1], [0], [0], [1], [0, 0, 1, 1], [], []>} : vector<16x64xf32>, vector<64x64xf32>, vector<16x64xf32> -> vector<16x64xf32>
    %c0_13 = arith.constant 0 : index
    %c0_14 = arith.constant 0 : index
    %44 = vector.load %arg7[%c0_13, %c0_14] : memref<16x64xf32, #tpu.memory_space<vmem>>, vector<16x64xf32>
    %45 = arith.addf %43, %44 : vector<16x64xf32>
    %c0_15 = arith.constant 0 : index
    %46 = memref.load %arg1[%c0_15] : memref<3xf32, #tpu.memory_space<smem>>
    %c1 = arith.constant 1 : index
    %47 = memref.load %arg1[%c1] : memref<3xf32, #tpu.memory_space<smem>>
    %c2 = arith.constant 2 : index
    %48 = memref.load %arg1[%c2] : memref<3xf32, #tpu.memory_space<smem>>
    %c0_16 = arith.constant 0 : index
    %c0_17 = arith.constant 0 : index
    %49 = vector.load %arg8[%c0_16, %c0_17] : memref<64x64xf32, #tpu.memory_space<vmem>>, vector<64x64xf32>
    %cst_18 = arith.constant dense<0.000000e+00> : vector<16x64xf32>
    %50 = tpu.matmul %45, %49, %cst_18 {dimension_numbers = #tpu.dot_dimension_numbers<[1], [0], [0], [1], [0, 0, 1, 1], [], []>} : vector<16x64xf32>, vector<64x64xf32>, vector<16x64xf32> -> vector<16x64xf32>
    %cst_19 = arith.constant 1.000000e+00 : f32
    %51 = arith.subf %cst_19, %46 : f32
    %52 = vector.broadcast %51 : f32 to vector<16x64xf32>
    %53 = arith.mulf %52, %45 : vector<16x64xf32>
    %54 = vector.broadcast %46 : f32 to vector<16x64xf32>
    %55 = arith.mulf %54, %50 : vector<16x64xf32>
    %56 = arith.addf %53, %55 : vector<16x64xf32>
    %cst_20 = arith.constant 1.000000e+00 : f32
    %57 = arith.subf %cst_20, %47 : f32
    %58 = arith.subf %57, %48 : f32
    %59 = vector.broadcast %58 : f32 to vector<16x64xf32>
    %60 = arith.mulf %59, %45 : vector<16x64xf32>
    %61 = vector.broadcast %47 : f32 to vector<16x64xf32>
    %62 = arith.mulf %61, %45 : vector<16x64xf32>
    %63 = vector.broadcast %48 : f32 to vector<16x64xf32>
    %64 = arith.mulf %63, %56 : vector<16x64xf32>
    %65 = arith.addf %62, %64 : vector<16x64xf32>
    %cst_21 = arith.constant dense<0.000000e+00> : vector<16x64xf32>
    %66 = tpu.matmul %65, %49, %cst_21 {dimension_numbers = #tpu.dot_dimension_numbers<[1], [0], [0], [1], [0, 0, 1, 1], [], []>} : vector<16x64xf32>, vector<64x64xf32>, vector<16x64xf32> -> vector<16x64xf32>
    %67 = arith.addf %60, %66 : vector<16x64xf32>
    %c0_22 = arith.constant 0 : index
    %c0_23 = arith.constant 0 : index
    %68 = vector.load %arg9[%c0_22, %c0_23] : memref<16x64xf32, #tpu.memory_space<vmem>>, vector<16x64xf32>
    tpu.vector_store %arg9[%c0_22, %c0_23], %67 {strides = array<i32>} : memref<16x64xf32, #tpu.memory_space<vmem>>, vector<16x64xf32>,
    return
  }
  func.func @transform_0(%arg0: i32) -> i32 {
    %c0_i32 = arith.constant 0 : i32
    %c0_i32_0 = arith.constant 0 : i32
    return %c0_i32 : i32
  }
  func.func @transform_1(%arg0: i32) -> (i32, i32) {
    %c0_i32 = arith.constant 0 : i32
    %c0_i32_0 = arith.constant 0 : i32
    %c0_i32_1 = arith.constant 0 : i32
    return %c0_i32, %c0_i32_0 : i32, i32
  }
  func.func @transform_2(%arg0: i32) -> (i32, i32) {
    %c0_i32 = arith.constant 0 : i32
    %c0_i32_0 = arith.constant 0 : i32
    %c0_i32_1 = arith.constant 0 : i32
    return %c0_i32, %c0_i32_0 : i32, i32
  }
  func.func @transform_3(%arg0: i32) -> (i32, i32) {
    %c0_i32 = arith.constant 0 : i32
    %c0_i32_0 = arith.constant 0 : i32
    %c0_i32_1 = arith.constant 0 : i32
    return %c0_i32, %c0_i32_0 : i32, i32
  }
  func.func @transform_4(%arg0: i32) -> (i32, i32) {
    %c0_i32 = arith.constant 0 : i32
    %c0_i32_0 = arith.constant 0 : i32
    %c0_i32_1 = arith.constant 0 : i32
    return %c0_i32, %c0_i32_0 : i32, i32
  }
  func.func @transform_5(%arg0: i32) -> (i32, i32) {
    %c0_i32 = arith.constant 0 : i32
    %c0_i32_0 = arith.constant 0 : i32
    %c0_i32_1 = arith.constant 0 : i32
    return %c0_i32, %c0_i32_0 : i32, i32
  }
  func.func @transform_6(%arg0: i32) -> (i32, i32) {
    %c0_i32 = arith.constant 0 : i32
    %c0_i32_0 = arith.constant 0 : i32
    %c0_i32_1 = arith.constant 0 : i32
    return %c0_i32, %c0_i32_0 : i32, i32
  }
  func.func @transform_7(%arg0: i32) -> (i32, i32) {
    %c0_i32 = arith.constant 0 : i32
    %c0_i32_0 = arith.constant 0 : i32
    %c0_i32_1 = arith.constant 0 : i32
    return %c0_i32, %c0_i32_0 : i32, i32
  }
  func.func @transform_8(%arg0: i32) -> (i32, i32) {
    %c0_i32 = arith.constant 0 : i32
    %c0_i32_0 = arith.constant 0 : i32
    %c0_i32_1 = arith.constant 0 : i32
    return %c0_i32, %c0_i32_0 : i32, i32
  }
}

</mosaic_0001>

<bundles_post_ra>
// kernel: tpu_custom_call.1
= control target key start
LH: loop header
LB: loop body
LE: loop exit
PB: predicated region body
PF: predicated region fallthrough
CT: control target
= control target key end

     0   :  { %13 = vsyncpa [#allocation4], 0  ;;  %s1668_s0 = inlined_call_operand.vmem [shape: f32[3], index: 0, kind: input, shape index: {}]   ;;  %s1669_s1 = inlined_call_operand.vmem [shape: s32[64,4], index: 1, kind: input, shape index: {}]   ;;  %s1670_s2 = inlined_call_operand.vmem [shape: f32[128,64], index: 2, kind: input, shape index: {}]   ;;  %s1671_s3 = inlined_call_operand.vmem [shape: f32[32,64], index: 3, kind: input, shape index: {}]   ;;  %s1672_s4 = inlined_call_operand.vmem [shape: f32[16,32], index: 4, kind: input, shape index: {}]   ;;  %s1673_s5 = inlined_call_operand.vmem [shape: f32[64,64], index: 5, kind: input, shape index: {}]   ;;  %s1674_s6 = inlined_call_operand.vmem [shape: f32[16,64], index: 6, kind: input, shape index: {}]   ;;  %s1675_s7 = inlined_call_operand.vmem [shape: f32[64,64], index: 7, kind: input, shape index: {}]   ;;  %s1676_s8 = inlined_call_operand.hbm [shape: f32[16,64], index: 8, kind: output, shape index: {}]  }
   0x1   :  { %14 = vsyncpa [#allocation3], 0  ;;  %s21_s29 = sshll.u32 %s1668_s0, 4  ;;  %s22_s29 = int_to_ptr.vmem [resolvable:$true] %s21_s29 }
   0x2   :  { %s1289_s30 = scalar_lea.vmem %s22_s29, 16  ;;  %p1294_p1 = scmp.lt.s32.totalorder %s22_s29, %s22_s29 }
   0x3   :  { %p1290_p0 = scmp.ne.s32.totalorder %s22_s29, %s1289_s30  ;;  %p1295_p2 = scmp.lt.s32.totalorder %s1289_s30, %s1289_s30 }
   0x5   :  { %p1296_p3 = por %p1295_p2, %p1294_p1 }
   0x7   :  { %p1297_p4 = pnand %p1296_p3, %p1290_p0 }
   0x9   :  { %1300 = shalt.err (!%p1297_p4)
}
   0xa   :  { %s1327_s9 = smov [#allocation2]  }
   0xb   :  { %24 = dma.vmem_to_smem %s22_s29, 16, %s1327_s9, [#allocation4]  }
   0xc   :  { %1323 = dma.done.wait [#allocation4], 16  }
   0xd   :  { %1324 = vsyncadd [#allocation4], 4294967280 }
   0xe   :  { %42 = sfence }
   0xf   :  { %v44_v0 = vld [vmem:[%s1669_s1 + $0x8] sm:$0xff]  ;;  %v43_v1 = vld [vmem:[%s1669_s1] sm:$0xff]  ;;  %v1328_v2 = vmov 3   ;;  %v1329_v3 = vmov 1   ;;  %v1395_v4 = vld [vmem:[%s1669_s1 + $0x10] sm:$0xff]  ;;  %v1330_v14 = vmov 0   ;;  %v51_v36 = vlaneseq }
  0x10   :  { %1274 = vset.pattern.permute.xlu0 %v1328_v2  ;;  %1270 = vset.pattern.permute.xlu1 %v1329_v3  ;;  %v280_v5 = vld [vmem:[%s1670_s2] sm:$0xff]  ;;  %v281_v6 = vld [vmem:[%s1670_s2 + $0x8] sm:$0xff]  ;;  %v282_v7 = vld [vmem:[%s1670_s2 + $0x10] sm:$0xff]  ;;  %v1331_v15 = vmov 2   ;;  %v1332_v42 = vmov 0.0   ;;  %s1636_s24 = sld [smem:[#allocation2 + $0x1]] }
  0x11   :  { %228 = vperm.xlu0 %1274, %v44_v0   ;;  %113 = vperm.xlu1 %1270, %v43_v1   ;;  %v283_v8 = vld [vmem:[%s1670_s2 + $0x18] sm:$0xff]  ;;  %v1157_v9 = vpack.c.bf16 %v281_v6, %v280_v5  ;;  %v284_v11 = vld [vmem:[%s1670_s2 + $0x20] sm:$0xff]  ;;  %v285_v12 = vld [vmem:[%s1670_s2 + $0x28] sm:$0xff]  ;;  %v1481_v39 = vand.u32 127, %v51_v36  ;;  %s1638_s25 = sld [smem:[#allocation2 + $0x2]] }
  0x12   :  { %v1161_v10 = vpack.c.bf16 %v283_v8, %v282_v7  ;;  %v1165_v13 = vpack.c.bf16 %v285_v12, %v284_v11  ;;  %v286_v16 = vld [vmem:[%s1670_s2 + $0x30] sm:$0xff]  ;;  %v287_v17 = vld [vmem:[%s1670_s2 + $0x38] sm:$0xff]  ;;  %v288_v19 = vld [vmem:[%s1670_s2 + $0x40] sm:$0xff] }
  0x13   :  { %1158 = vmatprep.subr.bf16.mxu0 %v1157_v9  ;;  %v1169_v18 = vpack.c.bf16 %v287_v17, %v286_v16  ;;  %v289_v20 = vld [vmem:[%s1670_s2 + $0x48] sm:$0xff]  ;;  %v290_v22 = vld [vmem:[%s1670_s2 + $0x50] sm:$0xff]  ;;  %v291_v23 = vld [vmem:[%s1670_s2 + $0x58] sm:$0xff]  ;;  %vm53_vm0 = vcmp.eq.s32.totalorder %v1481_v39, 87 }
  0x14   :  { %1160 = vmatpush3.bf16.msra.mxu0 %v1157_v9  ;;  %v1173_v21 = vpack.c.bf16 %v289_v20, %v288_v19  ;;  %v46_v24 = vld [vmem:[%s1669_s1 + $0x18] sm:$0xff]  ;;  %v1177_v25 = vpack.c.bf16 %v291_v23, %v290_v22  ;;  %v292_v26 = vld [vmem:[%s1670_s2 + $0x60] sm:$0xff]  ;;  %v293_v27 = vld [vmem:[%s1670_s2 + $0x68] sm:$0xff]  ;;  %v1485_v43 = vsel %vm53_vm0, 1.0, %v1332_v42 }
  0x15   :  { %231 = vperm.xlu0 %1274, %v1395_v4   ;;  %116 = vperm.xlu1 %1270, %v44_v0   ;;  %v48_v28 = vld [vmem:[%s1669_s1 + $0x28] sm:$0xff]  ;;  %v1181_v29 = vpack.c.bf16 %v293_v27, %v292_v26  ;;  %v294_v30 = vld [vmem:[%s1670_s2 + $0x70] sm:$0xff]  ;;  %v295_v31 = vld [vmem:[%s1670_s2 + $0x78] sm:$0xff] }
  0x16   :  { %1162 = vmatprep.subr.bf16.mxu0 %v1161_v10  ;;  %v47_v32 = vld [vmem:[%s1669_s1 + $0x20] sm:$0xff]  ;;  %v49_v33 = vld [vmem:[%s1669_s1 + $0x30] sm:$0xff]  ;;  %v1185_v34 = vpack.c.bf16 %v295_v31, %v294_v30  ;;  %v50_v35 = vld [vmem:[%s1669_s1 + $0x38] sm:$0xff]  ;;  %s789_s26 = ssub.f32 1.0, %s1636_s24 }
  0x18   :  { %1164 = vmatpush3.bf16.msra.mxu0 %v1161_v10  ;;  %s790_s27 = ssub.f32 %s789_s26, %s1638_s25 }
  0x19   :  { %1278 = vset.pattern.permute.xlu0 %v1330_v14  ;;  %1271 = vset.pattern.permute.xlu1 %v1331_v15 }
  0x1a   :  { %57 = vperm.xlu0 %1278, %v43_v1   ;;  %169 = vperm.xlu1 %1271, %v43_v1  }
  0x1b   :  { %1166 = vmatprep.subr.bf16.mxu0 %v1165_v13 }
  0x1c   :  { %1168 = vmatpush3.bf16.msra.mxu0 %v1165_v13 }
  0x1d   :  { %1170 = vmatprep.subr.bf16.mxu0 %v1169_v18 }
  0x1e   :  { %60 = vperm.xlu0 %1278, %v44_v0   ;;  %172 = vperm.xlu1 %1271, %v44_v0  }
  0x20   :  { %1172 = vmatpush3.bf16.msra.mxu0 %v1169_v18 }
  0x21   :  { %1174 = vmatprep.subr.bf16.mxu0 %v1173_v21 }
  0x22   :  { %63 = vperm.xlu0 %1278, %v1395_v4   ;;  %1272 = vset.pattern.permute.xlu1 %v1328_v2 }
  0x23   :  { %225 = vperm.xlu1 %1272, %v43_v1  }
  0x24   :  { %1176 = vmatpush3.bf16.msra.mxu0 %v1173_v21 }
  0x25   :  { %1178 = vmatprep.subr.bf16.mxu0 %v1177_v25 }
  0x26   :  { %66 = vperm.xlu0 %1278, %v46_v24  }
  0x27   :  { %1273 = vset.pattern.permute.xlu1 %v1329_v3 }
  0x28   :  { %122 = vperm.xlu1 %1273, %v46_v24   ;;  %1180 = vmatpush3.bf16.msra.mxu0 %v1177_v25 }
  0x29   :  { %1182 = vmatprep.subr.bf16.mxu0 %v1181_v29 }
  0x2a   :  { %72 = vperm.xlu0 %1278, %v48_v28  }
  0x2c   :  { %1275 = vset.pattern.permute.xlu1 %v1330_v14  ;;  %1184 = vmatpush3.bf16.msra.mxu0 %v1181_v29 }
  0x2d   :  { %69 = vperm.xlu1 %1275, %v47_v32   ;;  %1186 = vmatprep.subr.bf16.mxu0 %v1185_v34 }
  0x2e   :  { %75 = vperm.xlu0 %1278, %v49_v33  }
  0x30   :  { %1188 = vmatpush3.bf16.msra.mxu0 %v1185_v34 }
  0x31   :  { %1276 = vset.pattern.permute.xlu1 %v1331_v15 }
  0x32   :  { %1280 = vset.pattern.permute.xlu0 %v1329_v3  ;;  %175 = vperm.xlu1 %1276, %v1395_v4  }
  0x33   :  { %119 = vperm.xlu0 %1280, %v1395_v4  }
  0x36   :  { %178 = vperm.xlu1 %1276, %v46_v24  }
  0x37   :  { %134 = vperm.xlu0 %1280, %v50_v35  }
  0x3a   :  { %1277 = vset.pattern.permute.xlu1 %v1329_v3 }
  0x3b   :  { %125 = vperm.xlu1 %1277, %v47_v32   ;;  %1285 = vset.pattern.permute.xlu0 %v1331_v15 }
  0x3c   :  { %184 = vperm.xlu0 %1285, %v48_v28  }
  0x3f   :  { %128 = vperm.xlu1 %1277, %v48_v28  }
  0x40   :  { %190 = vperm.xlu0 %1285, %v50_v35  }
  0x43   :  { %1279 = vset.pattern.permute.xlu1 %v1328_v2 }
  0x44   :  { %234 = vperm.xlu1 %1279, %v46_v24   ;;  %1288 = vset.pattern.permute.xlu0 %v1328_v2 }
  0x48   :  { %1281 = vset.pattern.permute.xlu1 %v1331_v15 }
  0x49   :  { %181 = vperm.xlu1 %1281, %v47_v32  }
  0x4d   :  { %1282 = vset.pattern.permute.xlu1 %v1330_v14 }
  0x4e   :  { %78 = vperm.xlu1 %1282, %v50_v35  }
  0x52   :  { %1283 = vset.pattern.permute.xlu1 %v1329_v3 }
  0x53   :  { %131 = vperm.xlu1 %1283, %v49_v33  }
  0x57   :  { %1284 = vset.pattern.permute.xlu1 %v1328_v2 }
  0x58   :  { %237 = vperm.xlu1 %1284, %v47_v32  }
  0x5c   :  { %240 = vperm.xlu1 %1284, %v48_v28  }
  0x60   :  { %1286 = vset.pattern.permute.xlu1 %v1331_v15 }
  0x61   :  { %187 = vperm.xlu1 %1286, %v49_v33  }
  0x65   :  { %1287 = vset.pattern.permute.xlu1 %v1328_v2 }
  0x66   :  { %243 = vperm.xlu1 %1287, %v49_v33  }
  0x6a   :  { %246 = vperm.xlu1 %1287, %v50_v35  }
  0x90   :  { %v114_v37 = vpop.permute.xlu1 %113  ;;  %v229_v38 = vpop.permute.xlu0 %228 }
  0x91   :  { %vm136_vm2 = vcmp.eq.s32.totalorder %v1481_v39, %v114_v37  ;;  %vm249_vm6 = vcmp.eq.s32.totalorder %v1481_v39, %v229_v38 }
  0x92   :  { %v913_v50 = vsel %vm136_vm2, 1.0, %v1332_v42  ;;  %v930_v59 = vsel %vm249_vm6, 1.0, %v1332_v42 }
  0x94   :  { %v117_v40 = vpop.permute.xlu1 %116  ;;  %v232_v41 = vpop.permute.xlu0 %231 }
  0x95   :  { %vm137_vm3 = vcmp.eq.s32.totalorder %v1481_v39, %v117_v40  ;;  %vm250_vm10 = vcmp.eq.s32.totalorder %v1481_v39, %v232_v41 }
  0x96   :  { %v914_v54 = vsel %vm137_vm3, 1.0, %v1332_v42  ;;  %v931_v14 = vsel %vm250_vm10, 1.0, %v1332_v42 }
  0x99   :  { %v58_v44 = vpop.permute.xlu0 %57  ;;  %v170_v45 = vpop.permute.xlu1 %169 }
  0x9a   :  { %vm80_vm1 = vcmp.eq.s32.totalorder %v1481_v39, %v58_v44  ;;  %vm192_vm5 = vcmp.eq.s32.totalorder %v1481_v39, %v170_v45 }
  0x9b   :  { %v905_v46 = vsel %vm80_vm1, 1.0, %v1332_v42  ;;  %v921_v56 = vsel %vm192_vm5, 1.0, %v1332_v42 }
  0x9c   :  { %v104_v47 = vadd.f32 %v905_v46, %v1485_v43 }
  0x9d   :  { %v61_v48 = vpop.permute.xlu0 %60  ;;  %v173_v49 = vpop.permute.xlu1 %172 }
  0x9e   :  { %vm81_vm4 = vcmp.eq.s32.totalorder %v1481_v39, %v61_v48  ;;  %v160_v52 = vadd.f32 %v913_v50, %v104_v47  ;;  %vm193_vm7 = vcmp.eq.s32.totalorder %v1481_v39, %v173_v49 }
  0x9f   :  { %v906_v51 = vsel %vm81_vm4, 1.0, %v1332_v42  ;;  %v922_v60 = vsel %vm193_vm7, 1.0, %v1332_v42 }
  0xa0   :  { %v105_v53 = vadd.f32 %v906_v51, %v1485_v43  ;;  %v216_v61 = vadd.f32 %v921_v56, %v160_v52 }
  0xa1   :  { %v64_v55 = vpop.permute.xlu0 %63 }
  0xa2   :  { %v161_v57 = vadd.f32 %v914_v54, %v105_v53  ;;  %v226_v58 = vpop.permute.xlu1 %225  ;;  %vm82_vm9 = vcmp.eq.s32.totalorder %v1481_v39, %v64_v55 }
  0xa3   :  { %vm248_vm8 = vcmp.eq.s32.totalorder %v1481_v39, %v226_v58  ;;  %v907_v7 = vsel %vm82_vm9, 1.0, %v1332_v42 }
  0xa4   :  { %v217_v62 = vadd.f32 %v922_v60, %v161_v57  ;;  %v929_v63 = vsel %vm248_vm8, 1.0, %v1332_v42  ;;  %v106_v8 = vadd.f32 %v907_v7, %v1485_v43 }
  0xa5   :  { %v67_v0 = vpop.permute.xlu0 %66  ;;  %v272_v1 = vadd.f32 %v929_v63, %v216_v61 }
  0xa6   :  { %v273_v2 = vadd.f32 %v930_v59, %v217_v62  ;;  %vm83_vm13 = vcmp.eq.s32.totalorder %v1481_v39, %v67_v0 }
  0xa7   :  { %1055 = vmatprep.mubr.f32.mxu0 %v272_v1  ;;  %v123_v3 = vpop.permute.xlu1 %122  ;;  %v908_v19 = vsel %vm83_vm13, 1.0, %v1332_v42 }
  0xa8   :  { %1056 = vmatmul.mubr.f32.vlgmr.msra.gmra.mrb[0].mxu0 %v273_v2  ;;  %vm139_vm14 = vcmp.eq.s32.totalorder %v1481_v39, %v123_v3  ;;  %v107_v20 = vadd.f32 %v908_v19, %v1485_v43 }
  0xa9   :  { %v73_v4 = vpop.permute.xlu0 %72  ;;  %v916_v22 = vsel %vm139_vm14, 1.0, %v1332_v42 }
  0xaa   :  { %v163_v24 = vadd.f32 %v916_v22, %v107_v20  ;;  %vm85_vm1 = vcmp.eq.s32.totalorder %v1481_v39, %v73_v4  ;;  %v403_v22 = vld [vmem:[%s1671_s3 + $0x10] sm:$0xff] }
  0xab   :  { %v910_v32 = vsel %vm85_vm1, 1.0, %v1332_v42  ;;  %vm405_vm1 = vcmask 523264  }
  0xac   :  { %v70_v5 = vpop.permute.xlu1 %69  ;;  %v109_v37 = vadd.f32 %v910_v32, %v1485_v43 }
  0xad   :  { %v1506_v6 = vpop.permute.xlu0 %75  ;;  %vm84_vm2 = vcmp.eq.s32.totalorder %v1481_v39, %v70_v5 }
  0xae   :  { %v909_v33 = vsel %vm84_vm2, 1.0, %v1332_v42  ;;  %vm86_vm8 = vcmp.eq.s32.totalorder %v1481_v39, %v1506_v6  ;;  %vm513_vm2 = vcmask 261120  }
  0xaf   :  { %v108_v38 = vadd.f32 %v909_v33, %v1485_v43  ;;  %v911_v55 = vsel %vm86_vm8, 1.0, %v1332_v42 }
  0xb0   :  { %v110_v60 = vadd.f32 %v911_v55, %v1485_v43  ;;  %v691_v55 = vld [vmem:[%s1675_s7] sm:$0xff] }
  0xb1   :  { %v176_v9 = vpop.permute.xlu1 %175 }
  0xb2   :  { %v120_v10 = vpop.permute.xlu0 %119  ;;  %vm194_vm11 = vcmp.eq.s32.totalorder %v1481_v39, %v176_v9 }
  0xb3   :  { %vm138_vm12 = vcmp.eq.s32.totalorder %v1481_v39, %v120_v10  ;;  %v923_v15 = vsel %vm194_vm11, 1.0, %v1332_v42  ;;  %v401_v10 = vld [vmem:[%s1671_s3] sm:$0xff] }
  0xb4   :  { %v915_v11 = vsel %vm138_vm12, 1.0, %v1332_v42  ;;  %1083 = vmatprep.mubr.msk.f32.mxu1 %vm405_vm1, %v401_v10 }
  0xb5   :  { %v162_v12 = vadd.f32 %v915_v11, %v106_v8  ;;  %v179_v13 = vpop.permute.xlu1 %178 }
  0xb6   :  { %vm195_vm15 = vcmp.eq.s32.totalorder %v1481_v39, %v179_v13  ;;  %v135_v30 = vpop.permute.xlu0 %134 }
  0xb7   :  { %v218_v16 = vadd.f32 %v923_v15, %v162_v12  ;;  %v924_v23 = vsel %vm195_vm15, 1.0, %v1332_v42  ;;  %vm143_vm12 = vcmp.eq.s32.totalorder %v1481_v39, %v135_v30 }
  0xb8   :  { %v219_v26 = vadd.f32 %v924_v23, %v163_v24  ;;  %v920_v62 = vsel %vm143_vm12, 1.0, %v1332_v42  ;;  %v404_v23 = vld [vmem:[%s1671_s3 + $0x18] sm:$0xff]  ;;  %v511_v24 = vld [vmem:[%s1672_s4] sm:$0xff] }
  0xb9   :  { %v274_v17 = vadd.f32 %v931_v14, %v218_v16 }
  0xba   :  { %v126_v18 = vpop.permute.xlu1 %125 }
  0xbb   :  { %1058 = vmatprep.mubr.f32.mxu0 %v274_v17  ;;  %vm140_vm3 = vcmp.eq.s32.totalorder %v1481_v39, %v126_v18  ;;  %v185_v36 = vpop.permute.xlu0 %184 }
  0xbc   :  { %v917_v35 = vsel %vm140_vm3, 1.0, %v1332_v42  ;;  %vm197_vm6 = vcmp.eq.s32.totalorder %v1481_v39, %v185_v36 }
  0xbd   :  { %v164_v44 = vadd.f32 %v917_v35, %v108_v38  ;;  %v926_v48 = vsel %vm197_vm6, 1.0, %v1332_v42  ;;  %v598_v38 = vld [vmem:[%s1673_s5 + $0x8] sm:$0xff] }
  0xbe   :  { %v129_v21 = vpop.permute.xlu1 %128 }
  0xbf   :  { %vm141_vm4 = vcmp.eq.s32.totalorder %v1481_v39, %v129_v21  ;;  %v191_v58 = vpop.permute.xlu0 %190  ;;  %v402_v21 = vld [vmem:[%s1671_s3 + $0x8] sm:$0xff] }
  0xc0   :  { %v918_v40 = vsel %vm141_vm4, 1.0, %v1332_v42  ;;  %vm199_vm14 = vcmp.eq.s32.totalorder %v1481_v39, %v191_v58 }
  0xc1   :  { %v165_v46 = vadd.f32 %v918_v40, %v109_v37  ;;  %v928_v4 = vsel %vm199_vm14, 1.0, %v1332_v42  ;;  %v597_v37 = vld [vmem:[%s1673_s5] sm:$0xff] }
  0xc3   :  { %v235_v25 = vpop.permute.xlu1 %234  ;;  %v221_v52 = vadd.f32 %v926_v48, %v165_v46  ;;  %v600_v46 = vld [vmem:[%s1673_s5 + $0x18] sm:$0xff] }
  0xc4   :  { %vm251_vm0 = vcmp.eq.s32.totalorder %v1481_v39, %v235_v25 }
  0xc5   :  { %v932_v27 = vsel %vm251_vm0, 1.0, %v1332_v42 }
  0xc6   :  { %v275_v28 = vadd.f32 %v932_v27, %v219_v26 }
  0xc8   :  { %1059 = vmatmul.mubr.f32.gmra.mrb[2].mxu0 %v275_v28  ;;  %v182_v29 = vpop.permute.xlu1 %181 }
  0xc9   :  { %vm196_vm5 = vcmp.eq.s32.totalorder %v1481_v39, %v182_v29 }
  0xca   :  { %v925_v41 = vsel %vm196_vm5, 1.0, %v1332_v42 }
  0xcb   :  { %v220_v47 = vadd.f32 %v925_v41, %v164_v44  ;;  %v1213_v44 = vpack.c.bf16 %v598_v38, %v597_v37 }
  0xcd   :  { %v79_v31 = vpop.permute.xlu1 %78 }
  0xce   :  { %vm87_vm9 = vcmp.eq.s32.totalorder %v1481_v39, %v79_v31 }
  0xcf   :  { %v912_v56 = vsel %vm87_vm9, 1.0, %v1332_v42 }
  0xd0   :  { %v111_v61 = vadd.f32 %v912_v56, %v1485_v43  ;;  %v692_v56 = vld [vmem:[%s1675_s7 + $0x8] sm:$0xff] }
  0xd1   :  { %v1229_v58 = vpack.c.bf16 %v692_v56, %v691_v55 }
  0xd2   :  { %v132_v34 = vpop.permute.xlu1 %131  ;;  %v167_v2 = vadd.f32 %v920_v62, %v111_v61  ;;  %v695_v61 = vld [vmem:[%s1675_s7 + $0x20] sm:$0xff]  ;;  %v696_v62 = vld [vmem:[%s1675_s7 + $0x28] sm:$0xff] }
  0xd3   :  { %vm142_vm11 = vcmp.eq.s32.totalorder %v1481_v39, %v132_v34  ;;  %1230 = vmatprep.subr.bf16.mxu0 %v1229_v58 }
  0xd4   :  { %v919_v59 = vsel %vm142_vm11, 1.0, %v1332_v42  ;;  %v223_v8 = vadd.f32 %v928_v4, %v167_v2  ;;  %1232 = vmatpush3.bf16.msra.mxu0 %v1229_v58  ;;  %v697_v4 = vld [vmem:[%s1675_s7 + $0x30] sm:$0xff] }
  0xd5   :  { %v166_v0 = vadd.f32 %v919_v59, %v110_v60  ;;  %v694_v59 = vld [vmem:[%s1675_s7 + $0x18] sm:$0xff] }
  0xd7   :  { %v238_v45 = vpop.permute.xlu1 %237 }
  0xd8   :  { %vm252_vm7 = vcmp.eq.s32.totalorder %v1481_v39, %v238_v45  ;;  %v599_v45 = vld [vmem:[%s1673_s5 + $0x10] sm:$0xff] }
  0xd9   :  { %v933_v49 = vsel %vm252_vm7, 1.0, %v1332_v42  ;;  %v1217_v48 = vpack.c.bf16 %v600_v46, %v599_v45 }
  0xda   :  { %v276_v50 = vadd.f32 %v933_v49, %v220_v47  ;;  %v512_v47 = vld [vmem:[%s1672_s4 + $0x8] sm:$0xff]  ;;  %v601_v49 = vld [vmem:[%s1673_s5 + $0x20] sm:$0xff] }
  0xdb   :  { %v241_v51 = vpop.permute.xlu1 %240 }
  0xdc   :  { %vm253_vm10 = vcmp.eq.s32.totalorder %v1481_v39, %v241_v51  ;;  %1061 = vmatprep.mubr.f32.mxu0 %v276_v50  ;;  %v602_v50 = vld [vmem:[%s1673_s5 + $0x28] sm:$0xff] }
  0xdd   :  { %v934_v53 = vsel %vm253_vm10, 1.0, %v1332_v42  ;;  %v1221_v51 = vpack.c.bf16 %v602_v50, %v601_v49 }
  0xde   :  { %v277_v54 = vadd.f32 %v934_v53, %v221_v52  ;;  %v603_v52 = vld [vmem:[%s1673_s5 + $0x30] sm:$0xff]  ;;  %v604_v53 = vld [vmem:[%s1673_s5 + $0x38] sm:$0xff] }
  0xe0   :  { %1062 = vmatmul.mubr.f32.gmra.mrb[4].mxu0 %v277_v54  ;;  %v188_v57 = vpop.permute.xlu1 %187  ;;  %v1225_v54 = vpack.c.bf16 %v604_v53, %v603_v52 }
  0xe1   :  { %vm198_vm13 = vcmp.eq.s32.totalorder %v1481_v39, %v188_v57  ;;  %v693_v57 = vld [vmem:[%s1675_s7 + $0x10] sm:$0xff] }
  0xe2   :  { %v927_v63 = vsel %vm198_vm13, 1.0, %v1332_v42  ;;  %v1233_v60 = vpack.c.bf16 %v694_v59, %v693_v57 }
  0xe3   :  { %v222_v3 = vadd.f32 %v927_v63, %v166_v0  ;;  %v1237_v63 = vpack.c.bf16 %v696_v62, %v695_v61 }
  0xe4   :  { %1234 = vmatprep.subr.bf16.mxu0 %v1233_v60 }
  0xe5   :  { %v244_v1 = vpop.permute.xlu1 %243  ;;  %1236 = vmatpush3.bf16.msra.mxu0 %v1233_v60 }
  0xe6   :  { %vm254_vm15 = vcmp.eq.s32.totalorder %v1481_v39, %v244_v1  ;;  %1238 = vmatprep.subr.bf16.mxu0 %v1237_v63 }
  0xe7   :  { %v935_v5 = vsel %vm254_vm15, 1.0, %v1332_v42 }
  0xe8   :  { %v278_v6 = vadd.f32 %v935_v5, %v222_v3  ;;  %v698_v5 = vld [vmem:[%s1675_s7 + $0x38] sm:$0xff]  ;;  %s688_s7 = sld [smem:[#allocation2]] }
  0xe9   :  { %v247_v7 = vpop.permute.xlu1 %246  ;;  %1240 = vmatpush3.bf16.msra.mxu0 %v1237_v63 }
  0xea   :  { %vm255_vm0 = vcmp.eq.s32.totalorder %v1481_v39, %v247_v7  ;;  %1064 = vmatprep.mubr.f32.mxu0 %v278_v6  ;;  %v1241_v6 = vpack.c.bf16 %v698_v5, %v697_v4  ;;  %v606_v7 = vld [vmem:[%s1674_s6 + $0x8] sm:$0xff] }
  0xeb   :  { %v936_v43 = vsel %vm255_vm0, 1.0, %v1332_v42 }
  0xec   :  { %v279_v9 = vadd.f32 %v936_v43, %v223_v8  ;;  %1242 = vmatprep.subr.bf16.mxu0 %v1241_v6  ;;  %v605_v8 = vld [vmem:[%s1674_s6] sm:$0xff]  ;;  %s1333_s6 = smov [#allocation5]  }
  0xed   :  { %1244 = vmatpush3.bf16.msra.mxu0 %v1241_v6  ;;  %s892_s4 = sshll.u32 %s1333_s6, 4  ;;  %s893_s4 = int_to_ptr.vmem [resolvable:$true] %s892_s4 }
  0xee   :  { %1065 = vmatmul.mubr.f32.gmra.mrb[6].mxu0 %v279_v9  ;;  %v791_v9 = vstv %s790_s27  ;;  %s780_s2 = ssub.f32 1.0, %s688_s7  ;;  %s1301_s10 = scalar_lea.vmem %s893_s4, 256 }
  0xef   :  { %p1302_p5 = scmp.ne.s32.totalorder %s893_s4, %s1301_s10  ;;  %p1306_p6 = scmp.lt.s32.totalorder %s893_s4, %s893_s4 }
  0xf0   :  { %p1307_p7 = scmp.lt.s32.totalorder %s1301_s10, %s1301_s10 }
  0xf2   :  { %p1308_p8 = por %p1307_p7, %p1306_p6 }
  0xf4   :  { %p1309_p9 = pnand %p1308_p8, %p1302_p5 }
 0x17b   :  { %v1057_v11 = vpop.f32.mrb[0].mxu0 }
 0x17c   :  { %v362_v12 = vpop.f32.mrb[1].mxu0 }
 0x17d   :  { %v1189_v13 = vpack.c.bf16 %v1057_v11, %v362_v12 }
 0x17f   :  { %1190 = vmatprep.subr.bf16.mxu1 %v1189_v13 }
 0x180   :  { %1192 = vmatpush3.bf16.msra.mxu1 %v1189_v13 }
 0x19b   :  { %v1060_v14 = vpop.f32.mrb[2].mxu0 }
 0x19c   :  { %v372_v15 = vpop.f32.mrb[3].mxu0 }
 0x19d   :  { %v1193_v39 = vpack.c.bf16 %v1060_v14, %v372_v15 }
 0x19f   :  { %1194 = vmatprep.subr.bf16.mxu1 %v1193_v39 }
 0x1a0   :  { %1196 = vmatpush3.bf16.msra.mxu1 %v1193_v39  ;;  %v784_v39 = vstv %s688_s7 }
 0x1b3   :  { %v1063_v42 = vpop.f32.mrb[4].mxu0 }
 0x1b4   :  { %v382_v16 = vpop.f32.mrb[5].mxu0 }
 0x1b5   :  { %v1197_v17 = vpack.c.bf16 %v1063_v42, %v382_v16 }
 0x1b7   :  { %1198 = vmatprep.subr.bf16.mxu1 %v1197_v17 }
 0x1b8   :  { %1200 = vmatpush3.bf16.msra.mxu1 %v1197_v17 }
 0x1c1   :  { %v1066_v18 = vpop.f32.mrb[6].mxu0 }
 0x1c2   :  { %v392_v19 = vpop.f32.mrb[7].mxu0 }
 0x1c3   :  { %v1201_v20 = vpack.c.bf16 %v1066_v18, %v392_v19  ;;  %v794_v19 = vstv %s1636_s24 }
 0x1c5   :  { %1202 = vmatprep.subr.bf16.mxu1 %v1201_v20 }
 0x1c6   :  { %1204 = vmatpush3.bf16.msra.mxu1 %v1201_v20  ;;  %v797_v20 = vstv %s1638_s25 }
 0x1c9   :  { %1084 = vmatmul.mubr.msk.f32.vlgmr.msra.gmra.mrb[0].mxu1 %vm405_vm1, %v402_v21 }
 0x1ca   :  { %1086 = vmatprep.mubr.msk.f32.mxu1 %vm405_vm1, %v403_v22 }
 0x1cd   :  { %1087 = vmatmul.mubr.msk.f32.gmra.mrb[2].mxu1 %vm405_vm1, %v404_v23 }
 0x1ce   :  { %1097 = vmatprep.mubr.msk.f32.mxu1 %vm513_vm2, %v511_v24 }
 0x29c   :  { %v1085_v25 = vpop.f32.mrb[0].mxu1 }
 0x29d   :  { %v504_v26 = vadd.f32 %v1085_v25, %v1057_v11  ;;  %v484_v27 = vpop.f32.mrb[1].mxu1 }
 0x29e   :  { %v503_v28 = vadd.f32 %v484_v27, %v362_v12 }
 0x29f   :  { %v508_v29 = vmax.f32 %v504_v26, 0.0 }
 0x2a0   :  { %v507_v30 = vmax.f32 %v503_v28, 0.0  ;;  %v1088_v31 = vpop.f32.mrb[2].mxu1 }
 0x2a1   :  { %v506_v32 = vadd.f32 %v1088_v31, %v1060_v14  ;;  %v494_v33 = vpop.f32.mrb[3].mxu1 }
 0x2a2   :  { %v1205_v34 = vpack.c.bf16 %v508_v29, %v507_v30  ;;  %v505_v35 = vadd.f32 %v494_v33, %v372_v15  ;;  %v781_v15 = vstv %s780_s2 }
 0x2a3   :  { %v510_v36 = vmax.f32 %v506_v32, 0.0 }
 0x2a4   :  { %v509_v40 = vmax.f32 %v505_v35, 0.0  ;;  %1206 = vmatprep.subr.bf16.mxu1 %v1205_v34 }
 0x2a5   :  { %1208 = vmatpush3.bf16.msra.mxu1 %v1205_v34 }
 0x2a6   :  { %v1209_v41 = vpack.c.bf16 %v510_v36, %v509_v40 }
 0x2a8   :  { %1210 = vmatprep.subr.bf16.mxu1 %v1209_v41 }
 0x2a9   :  { %1212 = vmatpush3.bf16.msra.mxu1 %v1209_v41 }
 0x2aa   :  { %1214 = vmatprep.subr.bf16.mxu1 %v1213_v44 }
 0x2ac   :  { %1098 = vmatmul.mubr.msk.f32.vlgmr.msra.gmra.mrb[4].mxu1 %vm513_vm2, %v512_v47 }
 0x2ad   :  { %1216 = vmatpush3.bf16.msra.mxu1 %v1213_v44 }
 0x2ae   :  { %1218 = vmatprep.subr.bf16.mxu1 %v1217_v48 }
 0x2b1   :  { %1220 = vmatpush3.bf16.msra.mxu1 %v1217_v48 }
 0x2b2   :  { %1222 = vmatprep.subr.bf16.mxu1 %v1221_v51 }
 0x2b5   :  { %1224 = vmatpush3.bf16.msra.mxu1 %v1221_v51 }
 0x2b6   :  { %1226 = vmatprep.subr.bf16.mxu1 %v1225_v54 }
 0x2b9   :  { %1228 = vmatpush3.bf16.msra.mxu1 %v1225_v54 }
 0x2ba   :  { %1246 = vmatprep.subr.bf16.mxu1 %v1229_v58 }
 0x37f   :  { %v1099_v0 = vpop.f32.mrb[4].mxu1 }
 0x380   :  { %v586_v1 = vpop.f32.mrb[5].mxu1  ;;  %v596_v3 = vadd.f32 %v1099_v0, %v508_v29 }
 0x381   :  { %v595_v2 = vadd.f32 %v586_v1, %v507_v30 }
 0x383   :  { %1116 = vmatprep.mubr.msk.f32.mxu1 %vm405_vm1, %v595_v2 }
 0x384   :  { %1117 = vmatmul.mubr.msk.f32.vlgmr.msra.gmra.mrb[6].mxu1 %vm405_vm1, %v596_v3 }
 0x385   :  { %1248 = vmatpush3.bf16.msra.mxu1 %v1229_v58 }
 0x386   :  { %1250 = vmatprep.subr.bf16.mxu1 %v1233_v60 }
 0x389   :  { %1252 = vmatpush3.bf16.msra.mxu1 %v1233_v60 }
 0x38a   :  { %1254 = vmatprep.subr.bf16.mxu1 %v1237_v63 }
 0x38d   :  { %1256 = vmatpush3.bf16.msra.mxu1 %v1237_v63 }
 0x38e   :  { %1258 = vmatprep.subr.bf16.mxu1 %v1241_v6 }
 0x391   :  { %1260 = vmatpush3.bf16.msra.mxu1 %v1241_v6 }
 0x457   :  { %v1118_v43 = vpop.f32.mrb[6].mxu1 }
 0x458   :  { %v685_v10 = vadd.f32 %v1118_v43, %v606_v7  ;;  %v679_v11 = vpop.f32.mrb[7].mxu1 }
 0x459   :  { %v680_v12 = vadd.f32 %v679_v11, %v605_v8 }
 0x45a   :  { %v793_v13 = vmul.f32 %v791_v9, %v685_v10  ;;  %v783_v16 = vmul.f32 %v781_v15, %v685_v10  ;;  %v796_v25 = vmul.f32 %v794_v19, %v685_v10 }
 0x45b   :  { %1135 = vmatprep.mubr.msk.f32.mxu0 %vm405_vm1, %v680_v12  ;;  %v792_v14 = vmul.f32 %v791_v9, %v680_v12  ;;  %v782_v21 = vmul.f32 %v781_v15, %v680_v12  ;;  %v795_v27 = vmul.f32 %v794_v19, %v680_v12 }
 0x45c   :  { %1136 = vmatmul.mubr.msk.f32.vlgmr.msra.gmra.mrb[8].mxu0 %vm405_vm1, %v685_v10 }
 0x52f   :  { %v1137_v42 = vpop.f32.mrb[8].mxu0 }
 0x530   :  { %v786_v17 = vmul.f32 %v1137_v42, %v784_v39  ;;  %v771_v18 = vpop.f32.mrb[9].mxu0 }
 0x531   :  { %v785_v22 = vmul.f32 %v784_v39, %v771_v18 }
 0x532   :  { %v788_v23 = vadd.f32 %v786_v17, %v783_v16 }
 0x533   :  { %v787_v24 = vadd.f32 %v785_v22, %v782_v21 }
 0x534   :  { %v799_v26 = vmul.f32 %v797_v20, %v788_v23 }
 0x535   :  { %v798_v28 = vmul.f32 %v797_v20, %v787_v24 }
 0x536   :  { %v801_v29 = vadd.f32 %v799_v26, %v796_v25 }
 0x537   :  { %v800_v30 = vadd.f32 %v798_v28, %v795_v27 }
 0x539   :  { %1154 = vmatprep.mubr.msk.f32.mxu1 %vm405_vm1, %v800_v30 }
 0x53a   :  { %1155 = vmatmul.mubr.msk.f32.vlgmr.msra.gmra.mrb[8].mxu1 %vm405_vm1, %v801_v29 }
 0x60d   :  { %v1156_v31 = vpop.f32.mrb[8].mxu1 }
 0x60e   :  { %v884_v32 = vadd.f32 %v1156_v31, %v793_v13  ;;  %v874_v33 = vpop.f32.mrb[9].mxu1 }
 0x60f   :  { %v883_v34 = vadd.f32 %v874_v33, %v792_v14 }
 0x610   :  { %886 = vst.msk [vmem:[#allocation5 + $0x8] sm:$0xff] %vm405_vm1, %v884_v32 }
 0x611   :  { %885 = vst.msk [vmem:[#allocation5] sm:$0xff] %vm405_vm1, %v883_v34 }
 0x612   :  { %1312 = shalt.err (!%p1309_p9)
}
 0x613   :  { %s1313_s12 = scalar_lea.hbm %s1676_s8, 256 }
 0x614   :  { %p1314_p10 = scmp.ne.s32.totalorder %s1676_s8, %s1313_s12  ;;  %p1317_p11 = scmp.lt.u32.totalorder %s1313_s12, %s1676_s8 }
 0x616   :  { %p1319_p12 = pnand %p1317_p11, %p1314_p10 }
 0x618   :  { %1322 = shalt.err (!%p1319_p12)
}
 0x619   :  { %s1334_s16 = smov 128   ;;  %s1335_s17 = smov 8  }
 0x61a   :  { %898 = dma.vmem_to_hbm [thread:$0]  %s893_s4, 256, %s1676_s8, [#allocation3], %s1334_s16, %s1334_s16, %s1335_s17  }
 0x61b   :  { %1325 = dma.done.wait [#allocation3], 256  }
 0x61c   :  { %1326 = vsyncadd [#allocation3], 4294967040 }
 0x61d   :  { %902 = vsyncpa [#allocation3], 1 }
 0x61e   :  { %903 = vsyncpa [#allocation4], 1 }

</bundles_post_ra>
